<compile_context>
chip_gen: v7x
topology: tpu7x:2x2x1
jax: 0.10.0
libtpu: 0.0.40
codegen_flags: <defaults>
</compile_context>

<pallas_src>
import functools

import jax
import jax.numpy as jnp
from jax import lax
from jax.experimental import pallas as pl
from jax.experimental.pallas import tpu as pltpu


# ---------------------------------------------------------------------------
# Pass 1: per-row (row = one (b, c) pair) partial sums over the spatial axis.
# ---------------------------------------------------------------------------
def _pool_kernel(x_ref, sum_ref, *, hw, hw_tile, mask_tail):
    # x_ref:   (row_tile, hw_tile) block of x2
    # sum_ref: (row_tile, 1) f32 — same block for every hw step (accumulator)
    hi = pl.program_id(1)

    @pl.when(hi == 0)
    def _():
        sum_ref[...] = jnp.zeros_like(sum_ref)

    xv = x_ref[...].astype(jnp.float32)
    if mask_tail:
        # Zero the out-of-range lanes of the (only) ragged tail block.
        lane = lax.broadcasted_iota(jnp.int32, xv.shape, 1)
        xv = jnp.where(hi * hw_tile + lane < hw, xv, 0.0)
    sum_ref[...] += jnp.sum(xv, axis=-1, keepdims=True)


# ---------------------------------------------------------------------------
# Pass 2: o = x * g, gate broadcast along the lane (spatial) dimension.
# ---------------------------------------------------------------------------
def _scale_kernel(x_ref, g_ref, o_ref):
    # x_ref: (row_tile, hw_tile)   g_ref: (row_tile, 1)   o_ref: like x_ref
    o_ref[...] = (x_ref[...] * g_ref[...]).astype(o_ref.dtype)


def _pick_tiles(n_rows_total, hw, itemsize):
    # Lane tile: full extent when small (no (8,128) constraint then),
    # otherwise a multiple of 128.
    hw_tile = hw if hw <= 2048 else 2048
    # Sublane tile: multiple of 8 (or full extent), block ~<= 2 MiB so each
    # pallas_call stays well under the default scoped-VMEM limit with
    # double buffering on v5e / v6e / v7x.
    max_rows = max(8, (2 << 20) // max(1, hw_tile * itemsize))
    row_tile = min(n_rows_total, 512, max_rows)
    if row_tile < n_rows_total:
        row_tile = max(8, (row_tile // 8) * 8)
    return row_tile, hw_tile


@jax.jit
def squeeze_excite(x_nchw, w_reduce, b_reduce, w_expand, b_expand):
    """Forward pass of SqueezeExcite.

    x_nchw:   (B, C, H, W)
    w_reduce: (R, C, 1, 1), b_reduce: (R,)   -- PyTorch Conv2d layout
    w_expand: (C, R, 1, 1), b_expand: (C,)
    """
    B, C, H, W = x_nchw.shape
    R = w_reduce.shape[0]
    HW = H * W
    BC = B * C

    # (B, C, H, W) -> (B*C, H*W): contiguous reshape, no HBM copy.
    x2 = x_nchw.reshape(BC, HW)

    itemsize = jnp.dtype(x_nchw.dtype).itemsize
    row_tile, hw_tile = _pick_tiles(BC, HW, itemsize)
    n_rows = pl.cdiv(BC, row_tile)
    n_hw = pl.cdiv(HW, hw_tile)

    # ---------------- pass 1: spatial sums, (B*C, 1) f32 ------------------
    pool = functools.partial(_pool_kernel, hw=HW, hw_tile=hw_tile,
                             mask_tail=(HW % hw_tile) != 0)
    sums = pl.pallas_call(
        pool,
        out_shape=jax.ShapeDtypeStruct((BC, 1), jnp.float32),
        grid=(n_rows, n_hw),
        in_specs=[pl.BlockSpec((row_tile, hw_tile), lambda ri, hi: (ri, hi))],
        out_specs=pl.BlockSpec((row_tile, 1), lambda ri, hi: (ri, 0)),
        compiler_params=pltpu.CompilerParams(
            dimension_semantics=("parallel", "arbitrary")),
    )(x2)

    # ---------------- gate: tiny, computed exactly once in plain JAX ------
    pooled = sums.reshape(B, C) * jnp.float32(1.0 / HW)               # (B, C)
    wr = jnp.transpose(w_reduce.reshape(R, C)).astype(jnp.float32)    # (C, R)
    we = jnp.transpose(w_expand.reshape(C, R)).astype(jnp.float32)    # (R, C)
    h = jnp.maximum(pooled @ wr + b_reduce.astype(jnp.float32), 0.0)  # (B, R)
    g = jax.nn.sigmoid(h @ we + b_expand.astype(jnp.float32))         # (B, C)
    g2 = g.reshape(BC, 1)                                             # f32

    # ---------------- pass 2: o = x * g ------------------------------------
    out2 = pl.pallas_call(
        _scale_kernel,
        out_shape=jax.ShapeDtypeStruct((BC, HW), x_nchw.dtype),
        grid=(n_rows, n_hw),
        in_specs=[
            pl.BlockSpec((row_tile, hw_tile), lambda ri, hi: (ri, hi)),
            pl.BlockSpec((row_tile, 1), lambda ri, hi: (ri, 0)),
        ],
        out_specs=pl.BlockSpec((row_tile, hw_tile), lambda ri, hi: (ri, hi)),
        compiler_params=pltpu.CompilerParams(
            dimension_semantics=("parallel", "parallel")),
    )(x2, g2)

    return out2.reshape(B, C, H, W)


def squeeze_excite_ref(x_nchw, w_reduce, b_reduce, w_expand, b_expand):
    """Pure-JAX reference matching the PyTorch forward."""
    B, C, H, W = x_nchw.shape
    R = w_reduce.shape[0]
    pooled = x_nchw.reshape(B, C, -1).mean(-1)                       # (B, C)
    h = pooled @ w_reduce.reshape(R, C).T + b_reduce                 # (B, R)
    h = jnp.maximum(h, 0.0)
    g = h @ w_expand.reshape(C, R).T + b_expand                      # (B, C)
    g = jax.nn.sigmoid(g)
    return x_nchw * g[:, :, None, None]


if __name__ == "__main__":
    B, C, H, W = 2, 4, 16, 16
    R = 2  # reduce_chs

    key = jax.random.PRNGKey(0)
    kx, k1, k2, k3, k4 = jax.random.split(key, 5)

    x = jax.random.normal(kx, (B, C, H, W), dtype=jnp.float32)
    w_reduce = jax.random.normal(k1, (R, C, 1, 1), dtype=jnp.float32) * 0.1
    b_reduce = jax.random.normal(k2, (R,), dtype=jnp.float32) * 0.1
    w_expand = jax.random.normal(k3, (C, R, 1, 1), dtype=jnp.float32) * 0.1
    b_expand = jax.random.normal(k4, (C,), dtype=jnp.float32) * 0.1

    out = squeeze_excite(x, w_reduce, b_reduce, w_expand, b_expand)
    out = jax.block_until_ready(out)

    ref = squeeze_excite_ref(x, w_reduce, b_reduce, w_expand, b_expand)
    assert out.shape == (B, C, H, W)
    assert jnp.allclose(out, ref, atol=1e-5, rtol=1e-5), "mismatch vs reference"

    print("KERNEL_OK")
</pallas_src>

<mosaic_0001>
module attributes {stable_mosaic.version = 11 : i64} {
  func.func @_pool_kernel(%arg0: i32, %arg1: i32, %arg2: memref<8x256xf32, #tpu.memory_space<vmem>>, %arg3: memref<8x1xf32, #tpu.memory_space<vmem>>) attributes {dimension_semantics = [#tpu.dimension_semantics<parallel>, #tpu.dimension_semantics<arbitrary>], iteration_bounds = array<i64: 1, 1>, scalar_prefetch = 0 : i64, scratch_operands = 0 : i64, tpu.core_type = #tpu.core_type<tc>, window_params = [{transform_indices = @transform_0, window_bounds = array<i64: 8, 256>}, {transform_indices = @transform_1, window_bounds = array<i64: 8, 1>}]} {
    %c0_i32 = arith.constant 0 : i32
    %0 = arith.cmpi eq, %arg1, %c0_i32 : i32
    %1 = arith.extui %0 : i1 to i32
    %c0_i32_0 = arith.constant 0 : i32
    %2 = arith.cmpi ne, %1, %c0_i32_0 : i32
    scf.if %2 {
      %cst_6 = arith.constant 0.000000e+00 : f32
      %9 = vector.broadcast %cst_6 : f32 to vector<8x1xf32>
      %c0_7 = arith.constant 0 : index
      %c0_8 = arith.constant 0 : index
      %10 = vector.load %arg3[%c0_7, %c0_8] : memref<8x1xf32, #tpu.memory_space<vmem>>, vector<8x1xf32>
      tpu.vector_store %arg3[%c0_7, %c0_8], %9 {strides = array<i32>} : memref<8x1xf32, #tpu.memory_space<vmem>>, vector<8x1xf32>,
    } else {
    }
    %c0 = arith.constant 0 : index
    %c0_1 = arith.constant 0 : index
    %3 = vector.load %arg2[%c0, %c0_1] : memref<8x256xf32, #tpu.memory_space<vmem>>, vector<8x256xf32>
    %c0_2 = arith.constant 0 : index
    %c0_3 = arith.constant 0 : index
    %4 = vector.load %arg3[%c0_2, %c0_3] : memref<8x1xf32, #tpu.memory_space<vmem>>, vector<8x1xf32>
    %cst = arith.constant dense<0.000000e+00> : vector<8xf32>
    %5 = vector.multi_reduction <add>, %3, %cst [1] : vector<8x256xf32> to vector<8xf32>
    %6 = vector.shape_cast %5 : vector<8xf32> to vector<8x1xf32>
    %7 = arith.addf %4, %6 : vector<8x1xf32>
    %c0_4 = arith.constant 0 : index
    %c0_5 = arith.constant 0 : index
    %8 = vector.load %arg3[%c0_4, %c0_5] : memref<8x1xf32, #tpu.memory_space<vmem>>, vector<8x1xf32>
    tpu.vector_store %arg3[%c0_4, %c0_5], %7 {strides = array<i32>} : memref<8x1xf32, #tpu.memory_space<vmem>>, vector<8x1xf32>,
    return
  }
  func.func @transform_0(%arg0: i32, %arg1: i32) -> (i32, i32) {
    %c0_i32 = arith.constant 0 : i32
    return %arg0, %arg1 : i32, i32
  }
  func.func @transform_1(%arg0: i32, %arg1: i32) -> (i32, i32) {
    %c0_i32 = arith.constant 0 : i32
    %c0_i32_0 = arith.constant 0 : i32
    return %arg0, %c0_i32 : i32, i32
  }
}

module attributes {stable_mosaic.version = 11 : i64} {
  func.func @_scale_kernel(%arg0: i32, %arg1: i32, %arg2: memref<8x256xf32, #tpu.memory_space<vmem>>, %arg3: memref<8x1xf32, #tpu.memory_space<vmem>>, %arg4: memref<8x256xf32, #tpu.memory_space<vmem>>) attributes {dimension_semantics = [#tpu.dimension_semantics<parallel>, #tpu.dimension_semantics<parallel>], iteration_bounds = array<i64: 1, 1>, scalar_prefetch = 0 : i64, scratch_operands = 0 : i64, tpu.core_type = #tpu.core_type<tc>, window_params = [{transform_indices = @transform_0, window_bounds = array<i64: 8, 256>}, {transform_indices = @transform_1, window_bounds = array<i64: 8, 1>}, {transform_indices = @transform_2, window_bounds = array<i64: 8, 256>}]} {
    %c0 = arith.constant 0 : index
    %c0_0 = arith.constant 0 : index
    %0 = vector.load %arg2[%c0, %c0_0] : memref<8x256xf32, #tpu.memory_space<vmem>>, vector<8x256xf32>
    %c0_1 = arith.constant 0 : index
    %c0_2 = arith.constant 0 : index
    %1 = vector.load %arg3[%c0_1, %c0_2] : memref<8x1xf32, #tpu.memory_space<vmem>>, vector<8x1xf32>
    %2 = vector.broadcast %1 : vector<8x1xf32> to vector<8x256xf32>
    %3 = arith.mulf %0, %2 : vector<8x256xf32>
    %c0_3 = arith.constant 0 : index
    %c0_4 = arith.constant 0 : index
    %4 = vector.load %arg4[%c0_3, %c0_4] : memref<8x256xf32, #tpu.memory_space<vmem>>, vector<8x256xf32>
    tpu.vector_store %arg4[%c0_3, %c0_4], %3 {strides = array<i32>} : memref<8x256xf32, #tpu.memory_space<vmem>>, vector<8x256xf32>,
    return
  }
  func.func @transform_0(%arg0: i32, %arg1: i32) -> (i32, i32) {
    %c0_i32 = arith.constant 0 : i32
    return %arg0, %arg1 : i32, i32
  }
  func.func @transform_1(%arg0: i32, %arg1: i32) -> (i32, i32) {
    %c0_i32 = arith.constant 0 : i32
    %c0_i32_0 = arith.constant 0 : i32
    return %arg0, %c0_i32 : i32, i32
  }
  func.func @transform_2(%arg0: i32, %arg1: i32) -> (i32, i32) {
    %c0_i32 = arith.constant 0 : i32
    return %arg0, %arg1 : i32, i32
  }
}

</mosaic_0001>

<bundles_post_ra>
// kernel: squeeze_excite.2
= control target key start
LH: loop header
LB: loop body
LE: loop exit
PB: predicated region body
PF: predicated region fallthrough
CT: control target
= control target key end

     0   :  { %vm12_vm0 = vcmask 7168   ;;  %v28_v2 = vmov 0.0   ;;  %s54_s0 = inlined_call_operand.vmem [shape: f32[8,256], index: 0, kind: input, shape index: {}]   ;;  %s55_s1 = inlined_call_operand.vmem [shape: f32[8,1], index: 1, kind: output, shape index: {}]  }
   0x1   :  { %v14_v0 = vld [vmem:[%s54_s0] sm:$0xff]  ;;  %v15_v1 = vld [vmem:[%s54_s0 + $0x8] sm:$0xff]  ;;  %13 = vst.msk [vmem:[%s55_s1] sm:$0xff] %vm12_vm0, %v28_v2 }
   0x2   :  { %v17_v3 = vadd.f32 %v15_v1, %v14_v0 }
   0x4   :  { %18 = vadd.xlane.f32.xlu0 %v17_v3 }
   0x8   :  { %v16_v4 = vld [vmem:[%s55_s1] sm:$0xff] }
  0x91   :  { %v19_v5 = vpop.xlane.xlu0 %18 }
  0x92   :  { %v20_v6 = vadd.f32 %v19_v5, %v16_v4 }
  0x94   :  { %22 = vst.msk [vmem:[%s55_s1] sm:$0xff] %vm12_vm0, %v20_v6 }

// kernel: squeeze_excite.3
= control target key start
LH: loop header
LB: loop body
LE: loop exit
PB: predicated region body
PF: predicated region fallthrough
CT: control target
= control target key end

     0   :  { %v29_v0 = vmov 0   ;;  %s60_s1 = inlined_call_operand.vmem [shape: f32[8,1], index: 1, kind: input, shape index: {}]   ;;  %s61_s0 = inlined_call_operand.vmem [shape: f32[8,256], index: 0, kind: input, shape index: {}]   ;;  %s62_s2 = inlined_call_operand.vmem [shape: f32[8,256], index: 2, kind: output, shape index: {}]  }
   0x1   :  { %28 = vset.pattern.permute.xlu0 %v29_v0  ;;  %v13_v1 = vld [vmem:[%s60_s1] sm:$0xff]  ;;  %v12_v3 = vld [vmem:[%s61_s0 + $0x8] sm:$0xff] }
   0x2   :  { %16 = vperm.xlu0 %28, %v13_v1   ;;  %v11_v2 = vld [vmem:[%s61_s0] sm:$0xff] }
  0x81   :  { %v17_v4 = vpop.permute.xlu0 %16 }
  0x82   :  { %v19_v5 = vmul.f32 %v17_v4, %v11_v2  ;;  %v20_v6 = vmul.f32 %v17_v4, %v12_v3 }
  0x84   :  { %21 = vst [vmem:[%s62_s2] sm:$0xff] %v19_v5  ;;  %22 = vst [vmem:[%s62_s2 + $0x8] sm:$0xff] %v20_v6 }

</bundles_post_ra>
